<compile_context>
chip_gen: v7x
topology: tpu7x:2x2x1
jax: 0.10.0
libtpu: 0.0.40
codegen_flags: <defaults>
</compile_context>

<pallas_src>
import jax
import jax.numpy as jnp
import numpy as np
from jax.experimental import pallas as pl
from jax.experimental.pallas import tpu as pltpu

# Matmul-operand dtype. Set to jnp.bfloat16 on v6e/v7x for ~2x MXU throughput and
# half the operand DMA/VMEM bytes (accumulation stays f32 via preferred_element_type);
# kept f32 by default so the 1e-3 check against the f32 reference holds everywhere.
MATMUL_DTYPE = jnp.float32

_VMEM_LIMIT = 32 * 1024 * 1024  # safe scoped-VMEM budget on v5e / v6e / v7x


def _pick_row_tile(n, cap):
    """Largest row tile <= cap that evenly divides n (falls back to the full dim)."""
    if n <= cap:
        return n
    t = cap
    while t >= 8:
        if n % t == 0:
            return t
        t //= 2
    return n


# ----------------------------- Pallas kernels --------------------------------

def _make_mlp_kernel(arc_hidden, rel_hidden, mm_dtype):
    d0, d1, d2 = arc_hidden, 2 * arc_hidden, 2 * arc_hidden + rel_hidden

    def kernel(x_ref, w_ref, b_ref, ah_ref, ad_ref, rh_ref, rd_ref):
        # x: (TM, H), w: (H, 2*AH + 2*DR) fused, b: (1, 2*AH + 2*DR)
        y = jnp.dot(x_ref[...].astype(mm_dtype), w_ref[...].astype(mm_dtype),
                    preferred_element_type=jnp.float32)
        y = jnp.maximum(y + b_ref[...], 0.0)          # Linear + ReLU (f32 VPU)
        ah_ref[...] = y[:, :d0]
        ad_ref[...] = y[:, d0:d1]
        rh_ref[...] = y[:, d1:d2]
        rd_ref[...] = y[:, d2:]

    return kernel


def _make_biaffine_kernel(rel_hidden, label_num, mm_dtype):
    DR = rel_hidden
    DR1 = rel_hidden + 1

    def kernel(ad_ref, ah_ref, rd_ref, rh_ref,
               wam_ref, wab_ref, wrm_ref, wrb_ref,
               mcol_ref, mrow_ref,
               sarc_ref, dec_ref, rel_ref):
        # ---------------- arc bilinear (bias_x=True, bias_y=False) ----------------
        ad = ad_ref[0].astype(mm_dtype)                        # (TS, Da)
        ah = ah_ref[0].astype(mm_dtype)                        # (S,  Da)
        # bias_x handled as main matmul + broadcast row add (no ones column).
        tmp_a = jnp.dot(ad, wam_ref[...].astype(mm_dtype),
                        preferred_element_type=jnp.float32) + wab_ref[...]   # (TS, Da)
        s_arc = jax.lax.dot_general(tmp_a.astype(mm_dtype), ah,
                                    (((1,), (1,)), ((), ())),
                                    preferred_element_type=jnp.float32)      # (TS, S)
        sarc_ref[0] = s_arc

        # activate-word mask built in-kernel from (TS,1) x (1,S) vectors.
        mask2d = mcol_ref[0] * mrow_ref[0]                     # (TS, S)
        dec_ref[0] = jnp.where(mask2d > 0.0, s_arc, -jnp.inf)

        # -------- rel bilinear, all labels fused (bias_x=True, bias_y=True) -------
        rd = rd_ref[0].astype(mm_dtype)                        # (TS, Dr)
        rh = rh_ref[0].astype(mm_dtype)                        # (S,  Dr)
        # tmp[x, l*Dr1 + j] = sum_i rel_d_aug[x, i] * W_rel[l, i, j]
        tmp = jnp.dot(rd, wrm_ref[...].astype(mm_dtype),
                      preferred_element_type=jnp.float32) + wrb_ref[...]     # (TS, L*Dr1)
        parts = []
        for l in range(label_num):
            t_main = tmp[:, l * DR1:l * DR1 + DR].astype(mm_dtype)           # (TS, Dr)
            t_bias = tmp[:, l * DR1 + DR:(l + 1) * DR1]                      # (TS, 1)
            s_l = jax.lax.dot_general(t_main, rh, (((1,), (1,)), ((), ())),
                                      preferred_element_type=jnp.float32)    # (TS, S)
            parts.append((s_l + t_bias)[:, :, None])                         # (TS, S, 1)
        # write directly in the final (x, y, label) layout -> no wrapper transpose
        rel_ref[0] = jnp.concatenate(parts, axis=-1)                         # (TS, S, L)

    return kernel


# ------------------------------ wrapper --------------------------------------

def biaffine_forward(params, x, word_attention_mask, *,
                     mlp_row_tile=None, s_row_tile=None, matmul_dtype=MATMUL_DTYPE):
    """Forward of BiaffineClassifier (inference, labels=None).

    x: (B, T, input_size) f32, word_attention_mask: (B, T-2) bool.
    Returns (src_arc_logits (B,S,S), rel_logits (B,S,S,L), arc_logits (B,S,S)),
    S = T - 1, matching GraphResult fields of the PyTorch module.
    """
    B, T, H = x.shape
    S = T - 1
    AH = params["w_arc_h"].shape[1]
    DR = params["w_rel_h"].shape[1]
    L = params["w_rel_bilinear"].shape[0]
    DR1 = DR + 1
    f32 = jnp.float32

    # ------------------------- fused MLP heads -------------------------------
    inp = x[:, :-1, :].reshape(B * S, H)                       # input[:, :-1, :]
    w_fused = jnp.concatenate([params["w_arc_h"], params["w_arc_d"],
                               params["w_rel_h"], params["w_rel_d"]], axis=1)
    b_fused = jnp.concatenate([params["b_arc_h"], params["b_arc_d"],
                               params["b_rel_h"], params["b_rel_d"]]).reshape(1, -1)
    N, Dt = B * S, w_fused.shape[1]
    TM = mlp_row_tile or _pick_row_tile(N, 512)
    assert N % TM == 0, (N, TM)

    arc_h, arc_d, rel_h, rel_d = pl.pallas_call(
        _make_mlp_kernel(AH, DR, matmul_dtype),
        grid=(N // TM,),
        out_shape=(jax.ShapeDtypeStruct((N, AH), f32),
                   jax.ShapeDtypeStruct((N, AH), f32),
                   jax.ShapeDtypeStruct((N, DR), f32),
                   jax.ShapeDtypeStruct((N, DR), f32)),
        in_specs=[
            pl.BlockSpec((TM, H), lambda i: (i, 0)),           # activation row tile
            pl.BlockSpec((H, Dt), lambda i: (0, 0)),           # fused weight, resident
            pl.BlockSpec((1, Dt), lambda i: (0, 0)),           # fused bias, resident
        ],
        out_specs=(pl.BlockSpec((TM, AH), lambda i: (i, 0)),
                   pl.BlockSpec((TM, AH), lambda i: (i, 0)),
                   pl.BlockSpec((TM, DR), lambda i: (i, 0)),
                   pl.BlockSpec((TM, DR), lambda i: (i, 0))),
        compiler_params=pltpu.CompilerParams(
            dimension_semantics=("parallel",),
            vmem_limit_bytes=_VMEM_LIMIT),
    )(inp, w_fused, b_fused)

    arc_h = arc_h.reshape(B, S, AH)
    arc_d = arc_d.reshape(B, S, AH)
    rel_h = rel_h.reshape(B, S, DR)
    rel_d = rel_d.reshape(B, S, DR)

    # -------- biaffine weight prep (host side, tiny, one-time per call) --------
    w_arc = params["w_arc_bilinear"][0]                        # (Da+1, Da), out dim squeezed
    w_arc_main, w_arc_bias = w_arc[:AH, :], w_arc[AH:, :]      # (Da, Da), (1, Da)
    # w_rel_flat[i, l*Dr1 + j] = W_rel[l, i, j]
    w_rel_flat = jnp.transpose(params["w_rel_bilinear"], (1, 0, 2)).reshape(DR1, L * DR1)
    w_rel_main, w_rel_bias = w_rel_flat[:DR, :], w_rel_flat[DR:, :]

    # activate_word_mask = cat([mask[:, :1], mask], 1); (S,S) expansion done in-kernel.
    mask_ext = jnp.concatenate(
        [word_attention_mask[:, :1], word_attention_mask], axis=1).astype(f32)  # (B, S)
    mask_col = mask_ext[:, :, None]                            # (B, S, 1) row mask
    mask_row = mask_ext[:, None, :]                            # (B, 1, S) col mask

    TS = s_row_tile or _pick_row_tile(S, 256)
    assert S % TS == 0, (S, TS)

    s_arc, dec_arc, s_rel = pl.pallas_call(
        _make_biaffine_kernel(DR, L, matmul_dtype),
        grid=(B, S // TS),
        out_shape=(jax.ShapeDtypeStruct((B, S, S), f32),
                   jax.ShapeDtypeStruct((B, S, S), f32),
                   jax.ShapeDtypeStruct((B, S, S, L), f32)),
        in_specs=[
            pl.BlockSpec((1, TS, AH), lambda b, r: (b, r, 0)),     # arc_d row tile
            pl.BlockSpec((1, S, AH), lambda b, r: (b, 0, 0)),      # arc_h (full S)
            pl.BlockSpec((1, TS, DR), lambda b, r: (b, r, 0)),     # rel_d row tile
            pl.BlockSpec((1, S, DR), lambda b, r: (b, 0, 0)),      # rel_h (full S)
            pl.BlockSpec((AH, AH), lambda b, r: (0, 0)),           # resident weights
            pl.BlockSpec((1, AH), lambda b, r: (0, 0)),
            pl.BlockSpec((DR, L * DR1), lambda b, r: (0, 0)),
            pl.BlockSpec((1, L * DR1), lambda b, r: (0, 0)),
            pl.BlockSpec((1, TS, 1), lambda b, r: (b, r, 0)),      # mask rows
            pl.BlockSpec((1, 1, S), lambda b, r: (b, 0, 0)),       # mask cols
        ],
        out_specs=(pl.BlockSpec((1, TS, S), lambda b, r: (b, r, 0)),
                   pl.BlockSpec((1, TS, S), lambda b, r: (b, r, 0)),
                   pl.BlockSpec((1, TS, S, L), lambda b, r: (b, r, 0, 0))),
        compiler_params=pltpu.CompilerParams(
            dimension_semantics=("parallel", "parallel"),
            vmem_limit_bytes=_VMEM_LIMIT),
    )(arc_d, arc_h, rel_d, rel_h,
      w_arc_main, w_arc_bias, w_rel_main, w_rel_bias,
      mask_col, mask_row)

    # GraphResult(loss=None, arc_logits=dec_arc, rel_logits=s_rel, src_arc_logits=s_arc)
    return s_arc, s_rel, dec_arc


# --------------------------- pure-JAX reference --------------------------------

def reference_forward(params, x, word_attention_mask):
    inp = x[:, :-1, :]

    def mlp(w, b):
        return jnp.maximum(inp @ w + b, 0.0)

    arc_h = mlp(params["w_arc_h"], params["b_arc_h"])
    arc_d = mlp(params["w_arc_d"], params["b_arc_d"])
    rel_h = mlp(params["w_rel_h"], params["b_rel_h"])
    rel_d = mlp(params["w_rel_d"], params["b_rel_d"])

    ones = jnp.ones(inp.shape[:2] + (1,), jnp.float32)
    arc_d_aug = jnp.concatenate([arc_d, ones], -1)
    rel_d_aug = jnp.concatenate([rel_d, ones], -1)
    rel_h_aug = jnp.concatenate([rel_h, ones], -1)

    s_arc = jnp.einsum("bxi,oij,byj->boxy", arc_d_aug,
                       params["w_arc_bilinear"], arc_h)[:, 0]
    s_rel = jnp.einsum("bxi,oij,byj->boxy", rel_d_aug,
                       params["w_rel_bilinear"], rel_h_aug)
    s_rel = jnp.transpose(s_rel, (0, 2, 3, 1))

    mask_ext = jnp.concatenate(
        [word_attention_mask[:, :1], word_attention_mask], axis=1)
    m2 = mask_ext[:, :, None] & mask_ext[:, None, :]
    dec = jnp.where(m2, s_arc, -jnp.inf)
    return s_arc, s_rel, dec


# ----------------------------------- main --------------------------------------

if __name__ == "__main__":
    key = jax.random.PRNGKey(0)
    B, T, H = 2, 17, 32           # input: (B, T, input_size); S = T - 1 = 16
    ARC_H, REL_H, LABELS = 64, 32, 8

    ks = jax.random.split(key, 12)
    params = {
        "w_arc_h": 0.1 * jax.random.normal(ks[0], (H, ARC_H), jnp.float32),
        "b_arc_h": 0.1 * jax.random.normal(ks[1], (ARC_H,), jnp.float32),
        "w_arc_d": 0.1 * jax.random.normal(ks[2], (H, ARC_H), jnp.float32),
        "b_arc_d": 0.1 * jax.random.normal(ks[3], (ARC_H,), jnp.float32),
        "w_rel_h": 0.1 * jax.random.normal(ks[4], (H, REL_H), jnp.float32),
        "b_rel_h": 0.1 * jax.random.normal(ks[5], (REL_H,), jnp.float32),
        "w_rel_d": 0.1 * jax.random.normal(ks[6], (H, REL_H), jnp.float32),
        "b_rel_d": 0.1 * jax.random.normal(ks[7], (REL_H,), jnp.float32),
        # Bilinear weights: (out, in1 + bias_x, in2 + bias_y)
        "w_arc_bilinear": 0.1 * jax.random.normal(ks[8], (1, ARC_H + 1, ARC_H), jnp.float32),
        "w_rel_bilinear": 0.1 * jax.random.normal(ks[9], (LABELS, REL_H + 1, REL_H + 1), jnp.float32),
    }

    x = jax.random.normal(ks[10], (B, T, H), jnp.float32)
    # word_attention_mask: (B, T - 2) bool; last 5 words of batch 1 are padding.
    word_attention_mask = jnp.ones((B, T - 2), dtype=bool).at[1, -5:].set(False)

    # Small row tiles so the demo also exercises the multi-step tiled grids.
    s_arc, s_rel, dec_arc = biaffine_forward(params, x, word_attention_mask,
                                             mlp_row_tile=16, s_row_tile=8)
    jax.block_until_ready(s_arc)
    jax.block_until_ready(s_rel)
    jax.block_until_ready(dec_arc)

    r_arc, r_rel, r_dec = reference_forward(params, x, word_attention_mask)
    assert np.allclose(np.asarray(s_arc), np.asarray(r_arc), atol=1e-3, rtol=1e-3)
    assert np.allclose(np.asarray(s_rel), np.asarray(r_rel), atol=1e-3, rtol=1e-3)
    assert np.allclose(np.asarray(dec_arc), np.asarray(r_dec), atol=1e-3, rtol=1e-3)

    print("KERNEL_OK")
</pallas_src>

<mosaic_0001>
module attributes {stable_mosaic.version = 11 : i64} {
  func.func @kernel(%arg0: i32, %arg1: memref<16x32xf32, #tpu.memory_space<vmem>>, %arg2: memref<32x192xf32, #tpu.memory_space<vmem>>, %arg3: memref<1x192xf32, #tpu.memory_space<vmem>>, %arg4: memref<16x64xf32, #tpu.memory_space<vmem>>, %arg5: memref<16x64xf32, #tpu.memory_space<vmem>>, %arg6: memref<16x32xf32, #tpu.memory_space<vmem>>, %arg7: memref<16x32xf32, #tpu.memory_space<vmem>>) attributes {dimension_semantics = [#tpu.dimension_semantics<parallel>], iteration_bounds = array<i64: 2>, scalar_prefetch = 0 : i64, scratch_operands = 0 : i64, tpu.core_type = #tpu.core_type<tc>, window_params = [{transform_indices = @transform_0, window_bounds = array<i64: 16, 32>}, {pipeline_mode = #tpu.pipeline_mode<synchronous>, transform_indices = @transform_1, window_bounds = array<i64: 32, 192>}, {pipeline_mode = #tpu.pipeline_mode<synchronous>, transform_indices = @transform_2, window_bounds = array<i64: 1, 192>}, {transform_indices = @transform_3, window_bounds = array<i64: 16, 64>}, {transform_indices = @transform_4, window_bounds = array<i64: 16, 64>}, {transform_indices = @transform_5, window_bounds = array<i64: 16, 32>}, {transform_indices = @transform_6, window_bounds = array<i64: 16, 32>}]} {
    %c0 = arith.constant 0 : index
    %c0_0 = arith.constant 0 : index
    %0 = vector.load %arg1[%c0, %c0_0] : memref<16x32xf32, #tpu.memory_space<vmem>>, vector<16x32xf32>
    %c0_1 = arith.constant 0 : index
    %c0_2 = arith.constant 0 : index
    %1 = vector.load %arg2[%c0_1, %c0_2] : memref<32x192xf32, #tpu.memory_space<vmem>>, vector<32x192xf32>
    %cst = arith.constant dense<0.000000e+00> : vector<16x192xf32>
    %2 = tpu.matmul %0, %1, %cst {dimension_numbers = #tpu.dot_dimension_numbers<[1], [0], [0], [1], [0, 0, 1, 1], [], []>} : vector<16x32xf32>, vector<32x192xf32>, vector<16x192xf32> -> vector<16x192xf32>
    %c0_3 = arith.constant 0 : index
    %c0_4 = arith.constant 0 : index
    %3 = vector.load %arg3[%c0_3, %c0_4] : memref<1x192xf32, #tpu.memory_space<vmem>>, vector<1x192xf32>
    %4 = vector.broadcast %3 : vector<1x192xf32> to vector<16x192xf32>
    %5 = arith.addf %2, %4 : vector<16x192xf32>
    %cst_5 = arith.constant 0.000000e+00 : f32
    %6 = vector.broadcast %cst_5 : f32 to vector<16x192xf32>
    %7 = arith.maximumf %5, %6 : vector<16x192xf32>
    %8 = vector.extract_strided_slice %7 {offsets = [0, 0], sizes = [16, 64], strides = [1, 1]} : vector<16x192xf32> to vector<16x64xf32>
    %c0_6 = arith.constant 0 : index
    %c0_7 = arith.constant 0 : index
    %9 = vector.load %arg4[%c0_6, %c0_7] : memref<16x64xf32, #tpu.memory_space<vmem>>, vector<16x64xf32>
    tpu.vector_store %arg4[%c0_6, %c0_7], %8 {strides = array<i32>} : memref<16x64xf32, #tpu.memory_space<vmem>>, vector<16x64xf32>,
    %10 = vector.extract_strided_slice %7 {offsets = [0, 64], sizes = [16, 64], strides = [1, 1]} : vector<16x192xf32> to vector<16x64xf32>
    %c0_8 = arith.constant 0 : index
    %c0_9 = arith.constant 0 : index
    %11 = vector.load %arg5[%c0_8, %c0_9] : memref<16x64xf32, #tpu.memory_space<vmem>>, vector<16x64xf32>
    tpu.vector_store %arg5[%c0_8, %c0_9], %10 {strides = array<i32>} : memref<16x64xf32, #tpu.memory_space<vmem>>, vector<16x64xf32>,
    %12 = vector.extract_strided_slice %7 {offsets = [0, 128], sizes = [16, 32], strides = [1, 1]} : vector<16x192xf32> to vector<16x32xf32>
    %c0_10 = arith.constant 0 : index
    %c0_11 = arith.constant 0 : index
    %13 = vector.load %arg6[%c0_10, %c0_11] : memref<16x32xf32, #tpu.memory_space<vmem>>, vector<16x32xf32>
    tpu.vector_store %arg6[%c0_10, %c0_11], %12 {strides = array<i32>} : memref<16x32xf32, #tpu.memory_space<vmem>>, vector<16x32xf32>,
    %14 = vector.extract_strided_slice %7 {offsets = [0, 160], sizes = [16, 32], strides = [1, 1]} : vector<16x192xf32> to vector<16x32xf32>
    %c0_12 = arith.constant 0 : index
    %c0_13 = arith.constant 0 : index
    %15 = vector.load %arg7[%c0_12, %c0_13] : memref<16x32xf32, #tpu.memory_space<vmem>>, vector<16x32xf32>
    tpu.vector_store %arg7[%c0_12, %c0_13], %14 {strides = array<i32>} : memref<16x32xf32, #tpu.memory_space<vmem>>, vector<16x32xf32>,
    return
  }
  func.func @transform_0(%arg0: i32) -> (i32, i32) {
    %c0_i32 = arith.constant 0 : i32
    %c0_i32_0 = arith.constant 0 : i32
    return %arg0, %c0_i32 : i32, i32
  }
  func.func @transform_1(%arg0: i32) -> (i32, i32) {
    %c0_i32 = arith.constant 0 : i32
    %c0_i32_0 = arith.constant 0 : i32
    %c0_i32_1 = arith.constant 0 : i32
    return %c0_i32, %c0_i32_0 : i32, i32
  }
  func.func @transform_2(%arg0: i32) -> (i32, i32) {
    %c0_i32 = arith.constant 0 : i32
    %c0_i32_0 = arith.constant 0 : i32
    %c0_i32_1 = arith.constant 0 : i32
    return %c0_i32, %c0_i32_0 : i32, i32
  }
  func.func @transform_3(%arg0: i32) -> (i32, i32) {
    %c0_i32 = arith.constant 0 : i32
    %c0_i32_0 = arith.constant 0 : i32
    return %arg0, %c0_i32 : i32, i32
  }
  func.func @transform_4(%arg0: i32) -> (i32, i32) {
    %c0_i32 = arith.constant 0 : i32
    %c0_i32_0 = arith.constant 0 : i32
    return %arg0, %c0_i32 : i32, i32
  }
  func.func @transform_5(%arg0: i32) -> (i32, i32) {
    %c0_i32 = arith.constant 0 : i32
    %c0_i32_0 = arith.constant 0 : i32
    return %arg0, %c0_i32 : i32, i32
  }
  func.func @transform_6(%arg0: i32) -> (i32, i32) {
    %c0_i32 = arith.constant 0 : i32
    %c0_i32_0 = arith.constant 0 : i32
    return %arg0, %c0_i32 : i32, i32
  }
}

</mosaic_0001>

<bundles_post_ra>
// kernel: tpu_custom_call.1
= control target key start
LH: loop header
LB: loop body
LE: loop exit
PB: predicated region body
PF: predicated region fallthrough
CT: control target
= control target key end

     0   :  { %s1450_s0 = inlined_call_operand.hbm [shape: f32[32,32], index: 0, kind: input, shape index: {}]   ;;  %s1451_s1 = inlined_call_operand.hbm [shape: f32[32,192], index: 1, kind: input, shape index: {}]   ;;  %s1452_s2 = inlined_call_operand.vmem [shape: f32[1,192], index: 2, kind: input, shape index: {}]   ;;  %s1453_s3 = inlined_call_operand.hbm [shape: f32[32,64], index: 3, kind: output, shape index: {0}]   ;;  %s1454_s4 = inlined_call_operand.hbm [shape: f32[32,64], index: 4, kind: output, shape index: {1}]   ;;  %s1455_s5 = inlined_call_operand.hbm [shape: f32[32,32], index: 5, kind: output, shape index: {2}]   ;;  %s1456_s6 = inlined_call_operand.hbm [shape: f32[32,32], index: 6, kind: output, shape index: {3}]  }
   0x1   :  { %1467 = sst [smem:[#allocation18_spill]] %s1450_s0 }
   0x2   :  { %1468 = sst [smem:[#allocation19_spill]] %s1451_s1 }
   0x3   :  { %12 = vsyncpa [#allocation3], 0 }
   0x4   :  { %14 = vsyncpa [#allocation3 + $0x1], 0 }
   0x5   :  { %15 = vsyncpa [#allocation6], 0 }
   0x6   :  { %16 = vsyncpa [#allocation4], 0 }
   0x7   :  { %18 = vsyncpa [#allocation4 + $0x1], 0 }
   0x8   :  { %19 = vsyncpa [#allocation9], 0 }
   0x9   :  { %21 = vsyncpa [#allocation9 + $0x1], 0 }
   0xa   :  { %22 = vsyncpa [#allocation12], 0 }
   0xb   :  { %24 = vsyncpa [#allocation12 + $0x1], 0  ;;  %s1106_s21 = smov 0   ;;  %s1108_s22 = smov 0  }
   0xc   :  { %s1110_s23 = smov 0   ;;  %s1112_s24 = smov 0  }
   0xd LB: > { %s1127_s25 = sadd.s32 4294967295, %s1054_s24   ;;  %s1460_s26 = sadd.s32 4294967294, %s1054_s24   ;;  %s1054_s24 = sphi %s1112_s24, %s1492_s24   ;;  %s1050_s23 = sphi %s1110_s23, %s1491_s23   ;;  %s1046_s22 = sphi %s1108_s22, %s1490_s22   ;;  %s1042_s21 = sphi %s1106_s21, %s1489_s21  }
   0xe   : > { %p50_p0 = scmp.ne.s32.totalorder %s1046_s22, %s1042_s21  ;;  %p1457_p1 = scmp.eq.s32.totalorder %s1127_s25, 0 }
   0xf   : > { %p122_p3 = scmp.eq.s32.totalorder %s1460_s26, 1  ;;  %p707_p5 = scmp.ge.s32.totalorder %s1054_s24, 1 }
  0x10   : > { %p1138_p4 = por %p1457_p1, %p50_p0  ;;  %p207_p7 = scmp.lt.s32.totalorder %s1054_s24, 3 }
  0x11   : > { %p1143_p6 = por %p122_p3, %p50_p0  ;;  %s1056_s30 = smov [#allocation5]  }
  0x12   : > { %s1469_s27 = scalar_select %p1138_p4, 1, 0 }
  0x13   : > { %s1470_s28 = scalar_select %p1143_p6, 1, 0 }
  0x14   : > { %p1148_p8 = pnand %p707_p5, %p207_p7  ;;  %s219_s7 = sshll.u32 %s1056_s30, 4  ;;  %s1152_s7 = int_to_ptr.vmem [resolvable:$true] %s219_s7 }
  0x15   : > { %s1164_s9 = sadd.s32 1, %s1054_s24   ;;  %s37_s10 = sadd.s32 1, %s1050_s23 }
  0x16   : > { %s1471_s29 = scalar_select %p1148_p8, 1, 0 }
  0x17   : > { %p767_p9 = pneg %p1148_p8  ;;  %s34_s11 = ssub.s32 %s1054_s24, %s1164_s9 }
  0x18   : > { %s1473_s1 = sld [smem:[#allocation19_spill]] }
  0x19   : > { %p1159_p11 = pnand %p767_p9, %p1457_p1 }
  0x1b   : > { %p836_p13 = pneg %p1159_p11 }
  0x1e   : > { %s834_s14 = scalar_lea.hbm %s1473_s1, 1024 }
  0x1f   : > { %p835_p12 = scmp.ne.s32.totalorder %s1473_s1, %s834_s14  ;;  %p841_p5 = scmp.lt.u32.totalorder %s834_s14, %s1473_s1 }
  0x21   : > { %p837_p0 = pnand %p836_p13, %p835_p12 }
  0x23   : > { %p838_p3 = pneg %p837_p0 }
  0x25   : > { %p843_p7 = pnand %p841_p5, %p838_p3 }
  0x27   : > { %846 = shalt.err (!%p843_p7)
}
  0x28   : > { %s847_s19 = scalar_lea.vmem %s1152_s7, 1024  ;;  %p855_p2 = scmp.lt.s32.totalorder %s1152_s7, %s1152_s7 }
  0x29   : > { %p848_p9 = scmp.ne.s32.totalorder %s1152_s7, %s847_s19  ;;  %p856_p6 = scmp.lt.s32.totalorder %s847_s19, %s847_s19 }
  0x2b   : > { %p850_p10 = pnand %p848_p9, %p836_p13  ;;  %p857_p4 = por %p856_p6, %p855_p2 }
  0x2d   : > { %p851_p1 = pneg %p850_p10 }
  0x2f   : > { %p858_p8 = pnand %p857_p4, %p851_p1 }
  0x31   : > { %861 = shalt.err (!%p858_p8)
}
  0x32   : > { %s1057_s20 = smov 256   ;;  %s1058_s30 = smov 16  }
  0x33   : > { %770 = dma.hbm_to_vmem [thread:$0]  (!%p1159_p11), %s1473_s1, 1024, %s1152_s7, [#allocation6], %s1057_s20, %s1057_s20, %s1058_s30  }
  0x34   : > { %p35_p2 = scmp.eq.s32.totalorder %s34_s11, 0  ;;  %p44_p1 = scmp.ne.s32.totalorder %s1050_s23, %s1046_s22 }
  0x35   : > { %p45_p4 = scmp.eq.s32.totalorder %s1054_s24, 0  ;;  %p789_p6 = scmp.lt.s32.totalorder %s1054_s24, 2 }
  0x36   : > { %s1195_s14 = scalar_select %p35_p2, %s1050_s23, %s37_s10  }
  0x37   : > { %p46_p8 = por %p45_p4, %p44_p1  ;;  %p1474_p10 = scmp.eq.s32.totalorder %s1127_s25, 1 }
  0x38   : > { %s236_s16 = sand.u32 1, %s1050_s23   ;;  %s736_s17 = sshll.u32 %s1054_s24, 8 }
  0x39   : > { %p1199_p12 = por %p1474_p10, %p44_p1  ;;  %s710_s18 = sshll.u32 %s236_s16, 4 }
  0x3a   : > { %s1476_s0 = sld [smem:[#allocation18_spill]]  ;;  %s240_s7 = scalar_lea.vmem [#allocation2], %s710_s18 }
  0x3b   : > { %s247_s10 = sshll.u32 %s240_s7, 4  ;;  %p1210_p11 = pnand %p789_p6, %p46_p8  ;;  %s1214_s10 = int_to_ptr.vmem [resolvable:$true] %s247_s10 }
  0x3c   : > { %s1216_s20 = scalar_lea.sflag [#allocation3], %s236_s16 }
  0x3d   : > { %p864_p0 = pneg %p1210_p11 }
  0x40   : > { %s1208_s12 = scalar_lea.hbm %s1476_s0, %s736_s17  ;;  %s867_s18 = scalar_lea.hbm %s1476_s0, 512 }
  0x41   : > { %s862_s30 = scalar_lea.hbm %s1208_s12, 256  ;;  %p868_p7 = scmp.lt.u32.totalorder %s1208_s12, %s1476_s0 }
  0x42   : > { %p863_p13 = scmp.ne.s32.totalorder %s1208_s12, %s862_s30  ;;  %p869_p9 = scmp.lt.u32.totalorder %s867_s18, %s862_s30 }
  0x43   : > { %p871_p1 = scmp.lt.u32.totalorder %s862_s30, %s1208_s12 }
  0x44   : > { %p865_p3 = pnand %p864_p0, %p863_p13  ;;  %p870_p2 = por %p869_p9, %p868_p7 }
  0x46   : > { %p866_p5 = pneg %p865_p3  ;;  %p872_p4 = por %p871_p1, %p870_p2 }
  0x48   : > { %p873_p6 = pnand %p872_p4, %p866_p5 }
  0x4a   : > { %876 = shalt.err (!%p873_p6)
}
  0x4b   : > { %s877_s16 = scalar_lea.vmem %s1214_s10, 256  ;;  %s1059_s7 = smov [#allocation2]  }
  0x4c   : > { %p878_p8 = scmp.ne.s32.totalorder %s1214_s10, %s877_s16  ;;  %s882_s13 = sshll.u32 %s1059_s7, 4  ;;  %s883_s13 = int_to_ptr.vmem [resolvable:$false] %s882_s13 }
  0x4d   : > { %s884_s17 = scalar_lea.vmem %s883_s13, 512  ;;  %p885_p3 = scmp.lt.s32.totalorder %s1214_s10, %s883_s13 }
  0x4e   : > { %p880_p10 = pnand %p878_p8, %p864_p0  ;;  %p886_p7 = scmp.lt.s32.totalorder %s884_s17, %s877_s16 }
  0x50   : > { %p881_p13 = pneg %p880_p10  ;;  %p887_p9 = por %p886_p7, %p885_p3 }
  0x52   : > { %p888_p2 = pnand %p887_p9, %p881_p13 }
  0x54   : > { %891 = shalt.err (!%p888_p2)
}
  0x55   : > { %s1060_s30 = smov 128   ;;  %s1061_s18 = smov 8  }
  0x56   : > { %774 = dma.hbm_to_vmem [thread:$0]  (!%p1210_p11), %s1208_s12, 256, %s1214_s10, %s1216_s20, %s1060_s30, %s1060_s30, %s1061_s18  }
  0x57   : > { %p1478_p0 = scmp.ne.s32.totalorder %s1471_s29, 0 }
  0x58   : > { %s1247_s8 = sand.u32 (!%p1478_p0), 1, %s1046_s22   ;;  %p1479_p5 = scmp.ne.s32.totalorder (!%p1478_p0), %s1469_s27, 0 }
  0x59   : > { %259 = sbr.rel (%p1478_p0) target bundleno = 525 (0x20d), region = 32  ;;  %s1250_s19 = sshll.u32 (!%p1478_p0), %s1247_s8, 4 }
  0x5a   : > { %s262_s16 = scalar_lea.sflag (!%p1478_p0), [#allocation3], %s1247_s8  ;;  %s265_s7 = scalar_lea.vmem (!%p1478_p0), [#allocation2], %s1250_s19 }
  0x60   : > { %1021 = dma.done.wait (%p1479_p5), %s262_s16, 256  }
  0x61   : > { %1023 = vsyncadd (%p1479_p5), %s262_s16, 4294967040  ;;  %p1480_p11 = scmp.eq.s32.totalorder %s1127_s25, 0 }
  0x63   : > { %1025 = dma.done.wait (%p1480_p11), [#allocation6], 1024   ;;  %p1481_p1 = pmov %p1480_p11 }
  0x64   : > { %v1062_v0 = vmov 0.0   ;;  %v321_v1 = vld [vmem:[#allocation5 + $0x8] sm:$0xff]  ;;  %v323_v2 = vld [vmem:[#allocation5 + $0x18] sm:$0xff]  ;;  %v320_v3 = vld [vmem:[#allocation5] sm:$0xff]  ;;  %vm340_vm0 = vcmask 261120   ;;  %v330_v15 = vlaneseq  ;;  %s1268_s12 = sshll.u32 %s1127_s25, 8 }
  0x65   : > { %1027 = vsyncadd (%p1481_p1), [#allocation6], 4294966272  ;;  %411 = vmatprep.mubr.f32.mxu0 %v1062_v0  ;;  %417 = vmatprep.mubr.f32.mxu1 %v1062_v0  ;;  %v741_v4 = vpack.c.bf16 %v323_v2, %v321_v1  ;;  %v322_v5 = vld [vmem:[#allocation5 + $0x10] sm:$0xff]  ;;  %v325_v6 = vld [vmem:[#allocation5 + $0x28] sm:$0xff]  ;;  %s291_s10 = scalar_lea.vmem [#allocation7], %s1250_s19  ;;  %vm428_vm1 = vcmask 523264   ;;  %s1275_s17 = scalar_lea.hbm %s1453_s3, %s1268_s12 }
  0x66   : > { %v327_v7 = vld [vmem:[#allocation5 + $0x38] sm:$0xff]  ;;  %v743_v8 = vpack.c.bf16 %v322_v5, %v320_v3  ;;  %v324_v10 = vld [vmem:[#allocation5 + $0x20] sm:$0xff]  ;;  %v326_v11 = vld [vmem:[#allocation5 + $0x30] sm:$0xff]  ;;  %v331_v16 = vshrl.u32 %v330_v15, 7  ;;  %s482_s11 = sshll.u32 %s291_s10, 4  ;;  %s1462_s30 = smov 64   ;;  %s1277_s11 = int_to_ptr.vmem [resolvable:$true] %s482_s11 }
  0x67   : > { %v745_v9 = vpack.c.bf16 %v327_v7, %v325_v6  ;;  %742 = vmatprep.subr.bf16.mxu0 %v741_v4  ;;  %749 = vmatprep.subr.bf16.mxu1 %v741_v4  ;;  %v747_v12 = vpack.c.bf16 %v326_v11, %v324_v10  ;;  %v318_v13 = vld [vmem:[%s265_s7] sm:$0xff]  ;;  %v319_v14 = vld [vmem:[%s265_s7 + $0x8] sm:$0xff]  ;;  %s1283_s18 = scalar_lea.vmem [#allocation10], %s1250_s19  ;;  %s1461_s16 = smov 96  }
  0x68   : > { %744 = vmatpush1.bf16.msra.mxu0 %v743_v8  ;;  %751 = vmatpush1.bf16.msra.mxu1 %v743_v8  ;;  %v332_v17 = vsub.s32 0, %v331_v16  ;;  %v328_v18 = vld [vmem:[%s1452_s2] sm:$0x3]  ;;  %v336_v19 = vsub.s32 1, %v331_v16  ;;  %s454_s7 = scalar_lea.sflag [#allocation4], %s1247_s8  ;;  %s892_s27 = scalar_lea.vmem %s1277_s11, 256 }
  0x69   : > { %746 = vmatprep.subr.bf16.mxu0 %v745_v9  ;;  %750 = vmatprep.subr.bf16.mxu1 %v745_v9  ;;  %p893_p4 = scmp.ne.s32.totalorder %s1277_s11, %s892_s27  ;;  %s1065_s29 = smov [#allocation7]  }
  0x6a   : > { %v333_v20 = vrot.slane %v328_v18, %v332_v17  ;;  %v337_v21 = vrot.slane %v328_v18, %v336_v19  ;;  %s896_s20 = sshll.u32 %s1065_s29, 4  ;;  %s897_s20 = int_to_ptr.vmem [resolvable:$false] %s896_s20 }
  0x6b   : > { %p894_p6 = pnand %p893_p4, %p1199_p12  ;;  %p899_p10 = scmp.lt.s32.totalorder %s1277_s11, %s897_s20 }
  0x6c   : > { %748 = vmatpush1.bf16.msra.mxu0 %v747_v12  ;;  %752 = vmatpush1.bf16.msra.mxu1 %v747_v12 }
  0x6d   : > { %p895_p8 = pneg %p894_p6 }
  0x6f   : > { %720 = vmatmul.mubr.msk.f32.vlgmr.msra.gmra.mrb[0].mxu0 %vm340_vm0, %v318_v13  ;;  %721 = vmatmul.mubr.msk.f32.vlgmr.msra.gmra.mrb[0].mxu1 %vm340_vm0, %v319_v14 }
 0x142   : > { %v413_v22 = vpop.f32.mrb[0].mxu0  ;;  %v419_v23 = vpop.f32.mrb[0].mxu1 }
 0x143   : > { %v414_v24 = vadd.f32 %v413_v22, %v333_v20  ;;  %v415_v25 = vpop.f32.mrb[1].mxu0  ;;  %v420_v26 = vadd.f32 %v419_v23, %v333_v20  ;;  %v421_v27 = vpop.f32.mrb[1].mxu1 }
 0x144   : > { %v416_v28 = vadd.f32 %v415_v25, %v337_v21  ;;  %v422_v29 = vadd.f32 %v421_v27, %v337_v21 }
 0x145   : > { %v424_v30 = vmax.f32 %v414_v24, 0.0  ;;  %v426_v31 = vmax.f32 %v420_v26, 0.0 }
 0x146   : > { %v425_v32 = vmax.f32 %v416_v28, 0.0  ;;  %v427_v33 = vmax.f32 %v422_v29, 0.0 }
 0x147   : > { %433 = vrot.lane.b32.xlu0 %v424_v30, %s1462_s30  ;;  %430 = vst.msk [vmem:[%s291_s10 + $0x8] sm:$0xff] %vm428_vm1, %v426_v31  ;;  %429 = vst.msk [vmem:[%s291_s10] sm:$0xff] %vm428_vm1, %v424_v30  ;;  %s898_s10 = scalar_lea.vmem %s897_s20, 512 }
 0x148   : > { %441 = vst.msk [vmem:[%s1283_s18] sm:$0xff] %vm340_vm0, %v425_v32  ;;  %442 = vst.msk [vmem:[%s1283_s18 + $0x8] sm:$0xff] %vm340_vm0, %v427_v33  ;;  %445 = vrot.lane.b32.xlu1 %v425_v32, %s1461_s16  ;;  %p900_p13 = scmp.lt.s32.totalorder %s898_s10, %s892_s27 }
 0x14a   : > { %p901_p3 = por %p900_p13, %p899_p10 }
 0x14c   : > { %p902_p7 = pnand %p901_p3, %p895_p8 }
 0x14e   : > { %905 = shalt.err (!%p902_p7)
}
 0x14f   : > { %s906_s13 = scalar_lea.hbm %s1275_s17, 256  ;;  %s910_s29 = scalar_lea.hbm %s1453_s3, 512 }
 0x150   : > { %p907_p9 = scmp.ne.s32.totalorder %s1275_s17, %s906_s13  ;;  %p911_p5 = scmp.lt.u32.totalorder %s1275_s17, %s1453_s3 }
 0x151   : > { %p912_p11 = scmp.lt.u32.totalorder %s910_s29, %s906_s13  ;;  %p914_p4 = scmp.lt.u32.totalorder %s906_s13, %s1275_s17 }
 0x152   : > { %p908_p2 = pnand %p907_p9, %p1199_p12 }
 0x153   : > { %p913_p1 = por %p912_p11, %p911_p5 }
 0x154   : > { %p909_p0 = pneg %p908_p2 }
 0x155   : > { %p915_p6 = por %p914_p4, %p913_p1 }
 0x157   : > { %p916_p8 = pnand %p915_p6, %p909_p0 }
 0x159   : > { %919 = shalt.err (!%p916_p8)
}
 0x15a   : > { %s1463_s27 = smov 128   ;;  %s1465_s26 = smov 8  }
 0x15b   : > { %759 = dma.vmem_to_hbm [thread:$0]  (%p1199_p12), %s1277_s11, 256, %s1275_s17, %s454_s7, %s1463_s27, %s1463_s27, %s1465_s26  }
 0x15c   : > { %s1482_s30 = smov 64   ;;  %s1483_s16 = smov 96  }
 0x15d   : > { %435 = vrot.lane.b32.xlu0 %v426_v31, %s1482_s30  ;;  %447 = vrot.lane.b32.xlu1 %v427_v33, %s1483_s16  ;;  %s514_s10 = sshll.u32 %s1283_s18, 4  ;;  %s298_s13 = scalar_lea.vmem [#allocation8], %s1250_s19  ;;  %s1324_s10 = int_to_ptr.vmem [resolvable:$true] %s514_s10 }
 0x15e   : > { %s498_s29 = sshll.u32 %s298_s13, 4  ;;  %s458_s20 = sand.u32 1, %s1127_s25   ;;  %s1326_s29 = int_to_ptr.vmem [resolvable:$true] %s498_s29 }
 0x15f   : > { %s312_s0 = scalar_lea.vmem [#allocation11], %s1250_s19  ;;  %s1333_s18 = scalar_lea.hbm %s1454_s4, %s1268_s12 }
 0x160   : > { %s530_s1 = sshll.u32 %s312_s0, 4  ;;  %s1341_s7 = scalar_lea.hbm %s1455_s5, %s1268_s12  ;;  %s1335_s1 = int_to_ptr.vmem [resolvable:$true] %s530_s1 }
 0x161   : > { %s1348_s27 = scalar_lea.hbm %s1456_s6, %s1268_s12  ;;  %s1351_s11 = scalar_lea.sflag [#allocation9], %s458_s20 }
 0x162   : > { %s920_s17 = scalar_lea.vmem %s1326_s29, 256  ;;  %s1068_s25 = smov [#allocation8]  }
 0x163   : > { %p921_p10 = scmp.ne.s32.totalorder %s1326_s29, %s920_s17  ;;  %s924_s19 = sshll.u32 %s1068_s25, 4  ;;  %s925_s19 = int_to_ptr.vmem [resolvable:$false] %s924_s19 }
 0x164   : > { %s926_s26 = scalar_lea.vmem %s925_s19, 512  ;;  %p927_p7 = scmp.lt.s32.totalorder %s1326_s29, %s925_s19 }
 0x165   : > { %p922_p13 = pnand %p921_p10, %p1199_p12  ;;  %p928_p9 = scmp.lt.s32.totalorder %s926_s26, %s920_s17 }
 0x167   : > { %p923_p3 = pneg %p922_p13  ;;  %p929_p2 = por %p928_p9, %p927_p7 }
 0x169   : > { %p930_p0 = pnand %p929_p2, %p923_p3 }
 0x1b9   : > { %v434_v34 = vpop.permute.xlu0 %433 }
 0x1ba   : > { %439 = vst.msk [vmem:[%s298_s13] sm:$0xff] %vm428_vm1, %v434_v34  ;;  %v446_v35 = vpop.permute.xlu1 %445 }
 0x1bb   : > { %451 = vst.msk [vmem:[%s312_s0] sm:$0xff] %vm340_vm0, %v446_v35 }
 0x1cf   : > { %v436_v36 = vpop.permute.xlu0 %435  ;;  %v448_v37 = vpop.permute.xlu1 %447 }
 0x1d0   : > { %440 = vst.msk [vmem:[%s298_s13 + $0x8] sm:$0xff] %vm428_vm1, %v436_v36 }
 0x1d1   : > { %452 = vst.msk [vmem:[%s312_s0 + $0x8] sm:$0xff] %vm340_vm0, %v448_v37 }
 0x1d2   : > { %933 = shalt.err (!%p930_p0)
}
 0x1d3   : > { %s934_s0 = scalar_lea.hbm %s1333_s18, 256  ;;  %s938_s20 = scalar_lea.hbm %s1454_s4, 512 }
 0x1d4   : > { %p935_p5 = scmp.ne.s32.totalorder %s1333_s18, %s934_s0  ;;  %p939_p4 = scmp.lt.u32.totalorder %s1333_s18, %s1454_s4 }
 0x1d5   : > { %p940_p6 = scmp.lt.u32.totalorder %s938_s20, %s934_s0  ;;  %p942_p10 = scmp.lt.u32.totalorder %s934_s0, %s1333_s18 }
 0x1d6   : > { %p936_p11 = pnand %p935_p5, %p1199_p12 }
 0x1d7   : > { %p941_p8 = por %p940_p6, %p939_p4 }
 0x1d8   : > { %p937_p1 = pneg %p936_p11 }
 0x1d9   : > { %p943_p13 = por %p942_p10, %p941_p8 }
 0x1db   : > { %p944_p3 = pnand %p943_p13, %p937_p1 }
 0x1dd   : > { %947 = shalt.err (!%p944_p3)
}
 0x1de   : > { %s1484_s26 = smov 8   ;;  %s1485_s17 = smov 128  }
 0x1df   : > { %760 = dma.vmem_to_hbm [thread:$0]  (%p1199_p12), %s1326_s29, 256, %s1333_s18, %s1351_s11, %s1485_s17, %s1485_s17, %s1484_s26  }
 0x1e0   : > { %s948_s25 = scalar_lea.vmem %s1324_s10, 256  ;;  %s1069_s19 = smov [#allocation10]  }
 0x1e1   : > { %p949_p7 = scmp.ne.s32.totalorder %s1324_s10, %s948_s25  ;;  %s952_s0 = sshll.u32 %s1069_s19, 4  ;;  %s953_s0 = int_to_ptr.vmem [resolvable:$false] %s952_s0 }
 0x1e2   : > { %s954_s12 = scalar_lea.vmem %s953_s0, 512  ;;  %p955_p0 = scmp.lt.s32.totalorder %s1324_s10, %s953_s0 }
 0x1e3   : > { %p950_p9 = pnand %p949_p7, %p1199_p12  ;;  %p956_p5 = scmp.lt.s32.totalorder %s954_s12, %s948_s25 }
 0x1e5   : > { %p951_p2 = pneg %p950_p9  ;;  %p957_p11 = por %p956_p5, %p955_p0 }
 0x1e7   : > { %p958_p1 = pnand %p957_p11, %p951_p2 }
 0x1e9   : > { %961 = shalt.err (!%p958_p1)
}
 0x1ea   : > { %s962_s29 = scalar_lea.hbm %s1341_s7, 256  ;;  %s966_s20 = scalar_lea.hbm %s1455_s5, 512 }
 0x1eb   : > { %p963_p4 = scmp.ne.s32.totalorder %s1341_s7, %s962_s29  ;;  %p967_p10 = scmp.lt.u32.totalorder %s1341_s7, %s1455_s5 }
 0x1ec   : > { %p968_p13 = scmp.lt.u32.totalorder %s966_s20, %s962_s29  ;;  %p970_p7 = scmp.lt.u32.totalorder %s962_s29, %s1341_s7 }
 0x1ed   : > { %p964_p6 = pnand %p963_p4, %p1199_p12 }
 0x1ee   : > { %p969_p3 = por %p968_p13, %p967_p10 }
 0x1ef   : > { %p965_p8 = pneg %p964_p6 }
 0x1f0   : > { %p971_p9 = por %p970_p7, %p969_p3 }
 0x1f2   : > { %p972_p2 = pnand %p971_p9, %p965_p8 }
 0x1f4   : > { %975 = shalt.err (!%p972_p2)
}
 0x1f5   : > { %761 = dma.vmem_to_hbm [thread:$0]  (%p1199_p12), %s1324_s10, 256, %s1341_s7, %s1351_s11, %s1485_s17, %s1485_s17, %s1484_s26  }
 0x1f6   : > { %s469_s25 = scalar_lea.sflag [#allocation12], %s1247_s8  ;;  %s976_s19 = scalar_lea.vmem %s1335_s1, 256 }
 0x1f7   : > { %p977_p0 = scmp.ne.s32.totalorder %s1335_s1, %s976_s19  ;;  %s1070_s0 = smov [#allocation11]  }
 0x1f8   : > { %s980_s12 = sshll.u32 %s1070_s0, 4  ;;  %s981_s12 = int_to_ptr.vmem [resolvable:$false] %s980_s12 }
 0x1f9   : > { %p978_p5 = pnand %p977_p0, %p1199_p12  ;;  %s982_s29 = scalar_lea.vmem %s981_s12, 512 }
 0x1fa   : > { %p983_p1 = scmp.lt.s32.totalorder %s1335_s1, %s981_s12  ;;  %p984_p4 = scmp.lt.s32.totalorder %s982_s29, %s976_s19 }
 0x1fb   : > { %p979_p11 = pneg %p978_p5 }
 0x1fc   : > { %p985_p6 = por %p984_p4, %p983_p1 }
 0x1fe   : > { %p986_p8 = pnand %p985_p6, %p979_p11 }
 0x200   : > { %989 = shalt.err (!%p986_p8)
}
 0x201   : > { %s990_s10 = scalar_lea.hbm %s1348_s27, 256  ;;  %s994_s18 = scalar_lea.hbm %s1456_s6, 512 }
 0x202   : > { %p991_p10 = scmp.ne.s32.totalorder %s1348_s27, %s990_s10  ;;  %p995_p7 = scmp.lt.u32.totalorder %s1348_s27, %s1456_s6 }
 0x203   : > { %p996_p9 = scmp.lt.u32.totalorder %s994_s18, %s990_s10  ;;  %p998_p0 = scmp.lt.u32.totalorder %s990_s10, %s1348_s27 }
 0x204   : > { %p992_p13 = pnand %p991_p10, %p1199_p12 }
 0x205   : > { %p997_p2 = por %p996_p9, %p995_p7 }
 0x206   : > { %p993_p3 = pneg %p992_p13 }
 0x207   : > { %p999_p5 = por %p998_p0, %p997_p2 }
 0x209   : > { %p1000_p11 = pnand %p999_p5, %p993_p3 }
 0x20b   : > { %1003 = shalt.err (!%p1000_p11)
}
 0x20c   : > { %762 = dma.vmem_to_hbm [thread:$0]  (%p1199_p12), %s1335_s1, 256, %s1348_s27, %s469_s25, %s1485_s17, %s1485_s17, %s1484_s26  }
 0x20d PF: > { %s545_s30 = sand.u32 1, %s1042_s21   ;;  %p1486_p1 = scmp.ne.s32.totalorder %s1470_s28, 0 }
 0x20e   : > { %p1487_p4 = scmp.ge.s32.totalorder %s1054_s24, 2  ;;  %s546_s16 = scalar_lea.sflag [#allocation4], %s545_s30 }
 0x210   : > { %p776_p6 = pnand %p1487_p4, %p1486_p1 }
 0x212   : > { %1029 = dma.done.wait (!%p776_p6), %s546_s16, 256  }
 0x213   : > { %1031 = vsyncadd (!%p776_p6), %s546_s16, 4294967040  ;;  %s1488_s15 = sadd.s32 4294967294, %s1054_s24  }
 0x214   : > { %s554_s19 = sand.u32 1, %s1488_s15  }
 0x215   : > { %s555_s0 = scalar_lea.sflag [#allocation9], %s554_s19 }
 0x216   : > { %1033 = dma.done.wait (!%p776_p6), %s555_s0, 512  }
 0x217   : > { %1035 = vsyncadd (!%p776_p6), %s555_s0, 4294966784  ;;  %s573_s8 = scalar_lea.sflag [#allocation12], %s545_s30 }
 0x218   : > { %1037 = dma.done.wait (!%p776_p6), %s573_s8, 256  }
 0x219   : > { %1039 = vsyncadd (!%p776_p6), %s573_s8, 4294967040  ;;  %p27_p12 = scmp.ge.s32.totalorder %s1164_s9, 4   ;;  %s1489_s21 = smov %s1046_s22 }
 0x21a   : > { %s1490_s22 = smov %s1050_s23  ;;  %s1491_s23 = smov %s1195_s14 }
 0x21b   : > { %s1492_s24 = smov %s1164_s9  ;;  %29 = sbr.rel (!%p27_p12) target bundleno = 13 (0xd), region = 130 }
 0x222   :  { %578 = vsyncpa [#allocation3], 1 }
 0x223   :  { %580 = vsyncpa [#allocation3 + $0x1], 1 }
 0x224   :  { %581 = vsyncpa [#allocation6], 1 }
 0x225   :  { %582 = vsyncpa [#allocation4], 1 }
 0x226   :  { %584 = vsyncpa [#allocation4 + $0x1], 1 }
 0x227   :  { %585 = vsyncpa [#allocation9], 1 }
 0x228   :  { %587 = vsyncpa [#allocation9 + $0x1], 1 }
 0x229   :  { %588 = vsyncpa [#allocation12], 1 }
 0x22a   :  { %590 = vsyncpa [#allocation12 + $0x1], 1 }

</bundles_post_ra>
